<compile_context>
chip_gen: v5e
topology: v5e:2x2
jax: 0.10.0
libtpu: 0.0.40
codegen_flags: <defaults>
</compile_context>

<pallas_src>
import math

import jax
import jax.numpy as jnp
from jax.experimental import pallas as pl
from jax.experimental.pallas import tpu as pltpu


def _copy_kernel(x_ref, o_ref):
    # Identity copy of the current (tile_rows, lanes) tile resident in VMEM.
    o_ref[...] = x_ref[...]


# ~4 MiB per tile: with 1 input + 1 output, each double-buffered, that is
# ~16 MiB of live VMEM -- comfortably inside the 32 MiB scoped default on
# every generation (and well inside v7x's 64 MiB physical VMEM).
_TARGET_TILE_BYTES = 4 * 1024 * 1024
_MAX_LANES = 8192  # lane width cap (multiple of 128)


def _pick_lane_layout(total):
    """Pick (rows, lanes) with rows*lanes == total and lanes % 128 == 0.

    Prefers layouts whose row count is a multiple of 8 (full sublane
    occupancy -> unmasked stores); among those, the widest lane dim wins.
    Returns None if `total` has no multiple-of-128 divisor.
    """
    best_strict = None
    best_relaxed = None
    lanes = 128
    cap = min(total, _MAX_LANES)
    while lanes <= cap:
        if total % lanes == 0:
            rows = total // lanes
            best_relaxed = (rows, lanes)
            if rows % 8 == 0:
                best_strict = (rows, lanes)
        lanes += 128
    return best_strict if best_strict is not None else best_relaxed


def _identity_copy_tiled(x2d):
    """Row-tiled, double-buffered HBM->HBM copy of a lane-dense 2-D slab."""
    rows, lanes = x2d.shape
    row_bytes = lanes * x2d.dtype.itemsize

    # Row-tile: multiple of 8 (so every block satisfies the (8,128) rule and
    # stores stay unmasked), capped by the VMEM budget.  If the whole slab is
    # small enough, use a single full-extent block.
    cand = max(8, (_TARGET_TILE_BYTES // row_bytes) // 8 * 8)
    tile_rows = rows if cand >= rows else cand
    grid_r = pl.cdiv(rows, tile_rows)

    return pl.pallas_call(
        _copy_kernel,
        out_shape=jax.ShapeDtypeStruct((rows, lanes), x2d.dtype),
        grid=(grid_r,),
        in_specs=[pl.BlockSpec((tile_rows, lanes), lambda i: (i, 0))],
        out_specs=pl.BlockSpec((tile_rows, lanes), lambda i: (i, 0)),
        # Let XLA donate the input buffer to the output (identity copy into
        # the same positions, so overlap is harmless).
        input_output_aliases={0: 0},
        compiler_params=pltpu.CompilerParams(
            dimension_semantics=("parallel",)),
    )(x2d)


def _identity_copy_whole(x2d):
    """Fallback for shapes with no multiple-of-128 factorization (small only)."""
    return pl.pallas_call(
        _copy_kernel,
        out_shape=jax.ShapeDtypeStruct(x2d.shape, x2d.dtype),
        in_specs=[pl.BlockSpec(memory_space=pltpu.VMEM)],
        out_specs=pl.BlockSpec(memory_space=pltpu.VMEM),
        input_output_aliases={0: 0},
    )(x2d)


class Reshape:
    """JAX/Pallas equivalent of the PyTorch Reshape(nn.Module)."""

    def __init__(self, *args):
        self.shape = tuple(args)

    def __call__(self, x):
        b = x.shape[0]
        n = math.prod(x.shape[1:])
        n_target = math.prod(self.shape)
        assert n == n_target, (
            f"cannot view {x.shape} as {(b,) + self.shape}: {n} != {n_target}"
        )

        total = b * n
        layout = _pick_lane_layout(total)
        if layout is not None:
            rows, lanes = layout
            # Metadata-only flatten to the lane-dense slab the kernel wants.
            x2d = x.reshape(rows, lanes)
            out2d = _identity_copy_tiled(x2d)
        else:
            # No multiple-of-128 divisor: whole-array single-block copy.
            x2d = x.reshape(b, n)
            out2d = _identity_copy_whole(x2d)

        # Metadata-only re-interpretation, matching torch .view().
        return out2d.reshape((b,) + self.shape)


if __name__ == "__main__":
    key = jax.random.PRNGKey(0)

    # Primary example consistent with the GAN usage: (B=2, C=4, H=16, W=16).
    x = jax.random.normal(key, (2, 4, 16, 16), dtype=jnp.float32)
    reshape = Reshape(16, 64)                      # (2, 4, 16, 16) -> (2, 16, 64)
    y = jax.block_until_ready(reshape(x))

    expected = x.reshape((x.shape[0], 16, 64))
    assert y.shape == (2, 16, 64), y.shape
    assert y.dtype == x.dtype
    assert bool(jnp.array_equal(y, expected))

    # Secondary check: large enough to exercise the multi-step pipelined grid
    # (rows=256, tile_rows=128 -> 2 grid steps), still only 8 MiB.
    k2 = jax.random.PRNGKey(1)
    x2 = jax.random.normal(k2, (2, 16, 256, 256), dtype=jnp.float32)
    reshape2 = Reshape(4096, 256)                  # (2, 16, 256, 256) -> (2, 4096, 256)
    y2 = jax.block_until_ready(reshape2(x2))
    assert y2.shape == (2, 4096, 256), y2.shape
    assert bool(jnp.array_equal(y2, x2.reshape((2, 4096, 256))))

    print("KERNEL_OK")
</pallas_src>

<mosaic_0001>
module attributes {stable_mosaic.version = 11 : i64} {
  func.func @_copy_kernel(%arg0: i32, %arg1: memref<8x256xf32, #tpu.memory_space<vmem>>, %arg2: memref<8x256xf32, #tpu.memory_space<vmem>>) attributes {dimension_semantics = [#tpu.dimension_semantics<parallel>], iteration_bounds = array<i64: 1>, scalar_prefetch = 0 : i64, scratch_operands = 0 : i64, tpu.core_type = #tpu.core_type<tc>, window_params = [{transform_indices = @transform_0, window_bounds = array<i64: 8, 256>}, {transform_indices = @transform_1, window_bounds = array<i64: 8, 256>}]} {
    %c0 = arith.constant 0 : index
    %c0_0 = arith.constant 0 : index
    %0 = vector.load %arg1[%c0, %c0_0] : memref<8x256xf32, #tpu.memory_space<vmem>>, vector<8x256xf32>
    %c0_1 = arith.constant 0 : index
    %c0_2 = arith.constant 0 : index
    %1 = vector.load %arg2[%c0_1, %c0_2] : memref<8x256xf32, #tpu.memory_space<vmem>>, vector<8x256xf32>
    tpu.vector_store %arg2[%c0_1, %c0_2], %0 {strides = array<i32>} : memref<8x256xf32, #tpu.memory_space<vmem>>, vector<8x256xf32>,
    return
  }
  func.func @transform_0(%arg0: i32) -> (i32, i32) {
    %c0_i32 = arith.constant 0 : i32
    %c0_i32_0 = arith.constant 0 : i32
    return %arg0, %c0_i32 : i32, i32
  }
  func.func @transform_1(%arg0: i32) -> (i32, i32) {
    %c0_i32 = arith.constant 0 : i32
    %c0_i32_0 = arith.constant 0 : i32
    return %arg0, %c0_i32 : i32, i32
  }
}

</mosaic_0001>

<bundles_post_ra>
// kernel: tpu_custom_call.1
= control target key start
LH: loop header
LB: loop body
LE: loop exit
PB: predicated region body
PF: predicated region fallthrough
CT: control target
= control target key end

     0   :  { %6 = vsyncpa [#allocation3], 0  ;;  %s116_s0 = inlined_call_operand.hbm [shape: f32[8,256], index: 0, kind: input, shape index: {}, may-alias: {0,1}]   ;;  %s117_s1 = inlined_call_operand.hbm [shape: f32[8,256], index: 1, kind: output, shape index: {}, may-alias: {0,1}]  }
   0x1   :  { %7 = vsyncpa [#allocation4], 0  ;;  %s13_s8 = sshll.u32 %s116_s0, 4  ;;  %s98_s9 = smov [#allocation2]   ;;  %s14_s8 = int_to_ptr.hbm [resolvable:$true] %s13_s8 }
   0x2   :  { %s15_s10 = sshll.u32 %s98_s9, 4  ;;  %s16_s10 = int_to_ptr.vmem [resolvable:$true] %s15_s10 }
   0x3   :  { %18 = dma.hbm_to_vmem [thread:$0]  %s14_s8, 256, %s16_s10, [#allocation3]  }
   0x4   :  { %94 = dma.done.wait [#allocation3], 256  }
   0x5   :  { %95 = vsyncadd [#allocation3], 4294967040  ;;  %s99_s11 = smov [#allocation5]   ;;  %s34_s15 = sshll.u32 %s117_s1, 4  ;;  %v23_v0 = vld [vmem:[#allocation2] sm:$0xff]  ;;  %v24_v1 = vld [vmem:[#allocation2 + $0x8] sm:$0xff]  ;;  %s35_s15 = int_to_ptr.hbm [resolvable:$true] %s34_s15 }
   0x6   :  { %s32_s12 = sshll.u32 %s99_s11, 4  ;;  %25 = vst [vmem:[#allocation5] sm:$0xff] %v23_v0  ;;  %s33_s12 = int_to_ptr.vmem [resolvable:$true] %s32_s12 }
   0x7   :  { %26 = vst [vmem:[#allocation5 + $0x8] sm:$0xff] %v24_v1 }
   0x8   :  { %37 = dma.vmem_to_hbm [thread:$0]  %s33_s12, 256, %s35_s15, [#allocation4]  }
   0x9   :  { %96 = dma.done.wait [#allocation4], 256  }
   0xa   :  { %97 = vsyncadd [#allocation4], 4294967040 }
   0xb   :  { %42 = vsyncpa [#allocation3], 1 }
   0xc   :  { %43 = vsyncpa [#allocation4], 1 }

</bundles_post_ra>
